<compile_context>
chip_gen: v7x
topology: tpu7x:2x2x1
jax: 0.10.0
libtpu: 0.0.40
codegen_flags: <defaults>
</compile_context>

<pallas_src>
import functools

import jax
import jax.numpy as jnp
from jax.experimental import pallas as pl
from jax.experimental.pallas import tpu as pltpu


_LANE = 128
_TARGET_BLOCK_BYTES = 2 * 1024 * 1024      # ~2 MiB lane-dense blocks
_SINGLE_BLOCK_BYTES = 512 * 1024           # above this -> >= _MIN_GRID_STEPS blocks
_MIN_GRID_STEPS = 4                        # overlap + both v7x TCs busy
_WHOLE_BLOCK_MAX_BYTES = 4 * 1024 * 1024   # small/lane-ragged: one full-array block
_FUSED_TREE_MAX_BYTES = 8 * 1024 * 1024    # sum(p1 bytes); 3x resident < VMEM limit
_VMEM_LIMIT_BYTES = 32 * 1024 * 1024       # explicit scoped-VMEM cap (v5e/v6e/v7x safe)


# ----------------------------------------------------------------------------
# Kernels
# ----------------------------------------------------------------------------
def _soft_update_kernel(p1_ref, p2_ref, o_ref, *, rate):
    # new_params = rate * p1 + (1 - rate) * p2, accumulated in f32 so the
    # small (rate) contribution survives bf16/fp8 parameters.
    p1 = p1_ref[...].astype(jnp.float32)
    p2 = p2_ref[...].astype(jnp.float32)
    o_ref[...] = (rate * p1 + (1.0 - rate) * p2).astype(o_ref.dtype)


def _make_fused_copy_kernel(n):
    # refs = (in_0 .. in_{n-1}, out_0 .. out_{n-1}); identity pass-through.
    def kernel(*refs):
        for i in range(n):
            refs[n + i][...] = refs[i][...]
    return kernel


def _make_fused_soft_update_kernel(n, rate):
    # refs = (p1_0 .. p1_{n-1}, p2_0 .. p2_{n-1}, out_0 .. out_{n-1}).
    def kernel(*refs):
        for i in range(n):
            a = refs[i][...].astype(jnp.float32)
            b = refs[n + i][...].astype(jnp.float32)
            refs[2 * n + i][...] = (rate * a + (1.0 - rate) * b).astype(
                refs[2 * n + i].dtype)
    return kernel


# ----------------------------------------------------------------------------
# Layout helpers
# ----------------------------------------------------------------------------
def _sublane_granule(dtype):
    itemsize = jnp.dtype(dtype).itemsize
    return 8 * max(1, 4 // itemsize)  # 8 rows f32, 16 bf16, 32 int8


def _as_2d(x):
    return x if x.ndim >= 2 else x.reshape(1, -1)


def _lane_cols(n):
    """Widest lane-dense column count dividing n (None if not 128-divisible)."""
    for cols in (4096, 2048, 1024, 512, 256, _LANE):
        if n % cols == 0:
            return cols
    return None


def _row_tiling(rows, cols, dtype):
    """(block_rows, grid_steps): ~2 MiB blocks, >=4 steps for arrays >512 KiB."""
    granule = _sublane_granule(dtype)
    itemsize = jnp.dtype(dtype).itemsize
    total_bytes = rows * cols * itemsize
    if total_bytes <= _SINGLE_BLOCK_BYTES or rows <= 2 * granule:
        return rows, 1
    by_bytes = _TARGET_BLOCK_BYTES // (cols * itemsize)
    by_steps = rows // _MIN_GRID_STEPS
    block_rows = max(granule, (min(by_bytes, by_steps) // granule) * granule)
    block_rows = min(block_rows, rows)
    return block_rows, int(pl.cdiv(rows, block_rows))


# ----------------------------------------------------------------------------
# forward
# ----------------------------------------------------------------------------
def rl_network_forward(*x):
    """RLNetwork.forward(*x) -> x.

    The reference forward is the identity, so the fastest correct
    implementation returns the inputs untouched (zero HBM traffic).
    """
    return x


def rl_network_forward_pallas(*xs):
    """Identity forward materialized through ONE fused pallas_call.

    One input ref + one output ref per tensor, whole-array blocks, single
    launch -- for callers that need fresh output buffers.
    """
    views = [_as_2d(x) for x in xs]
    outs = pl.pallas_call(
        _make_fused_copy_kernel(len(views)),
        out_shape=tuple(jax.ShapeDtypeStruct(v.shape, v.dtype) for v in views),
        compiler_params=pltpu.CompilerParams(vmem_limit_bytes=_VMEM_LIMIT_BYTES),
    )(*views)
    if not isinstance(outs, (tuple, list)):
        outs = (outs,)
    return tuple(o.reshape(x.shape) for o, x in zip(outs, xs))


# ----------------------------------------------------------------------------
# soft_update
# ----------------------------------------------------------------------------
def _soft_update_tiled(p1, p2, rate, cols):
    """Lane-dense, grid-tiled blend for tensors whose size divides cols."""
    a2d = p1.reshape(-1, cols)
    b2d = p2.reshape(-1, cols)
    rows = a2d.shape[0]
    block_rows, steps = _row_tiling(rows, cols, p1.dtype)
    out2d = pl.pallas_call(
        functools.partial(_soft_update_kernel, rate=float(rate)),
        out_shape=jax.ShapeDtypeStruct(a2d.shape, a2d.dtype),
        grid=(steps,),
        in_specs=[pl.BlockSpec((block_rows, cols), lambda i: (i, 0)),
                  pl.BlockSpec((block_rows, cols), lambda i: (i, 0))],
        out_specs=pl.BlockSpec((block_rows, cols), lambda i: (i, 0)),
        input_output_aliases={0: 0},  # result written into p1's slab (copy_)
        compiler_params=pltpu.CompilerParams(
            dimension_semantics=("parallel",),
            vmem_limit_bytes=_VMEM_LIMIT_BYTES),
    )(a2d, b2d)
    return out2d.reshape(p1.shape)


def _soft_update_whole(p1, p2, rate):
    """Single full-array block (no grid, no reshape/pad) for small/ragged tensors."""
    a = _as_2d(p1)
    b = _as_2d(p2)
    out = pl.pallas_call(
        functools.partial(_soft_update_kernel, rate=float(rate)),
        out_shape=jax.ShapeDtypeStruct(a.shape, a.dtype),
        input_output_aliases={0: 0},
        compiler_params=pltpu.CompilerParams(vmem_limit_bytes=_VMEM_LIMIT_BYTES),
    )(a, b)
    return out.reshape(p1.shape)


def soft_update(p1, p2, update_rate):
    """new_p1 = rate * p1 + (1 - rate) * p2 (RLNetwork.soft_update blend)."""
    assert p1.shape == p2.shape and p1.dtype == p2.dtype
    n = int(p1.size)
    if n == 0:
        return p1
    cols = _lane_cols(n)
    if cols is not None:
        return _soft_update_tiled(p1, p2, update_rate, cols)
    if p1.nbytes <= _WHOLE_BLOCK_MAX_BYTES:
        return _soft_update_whole(p1, p2, update_rate)
    # Rare: large AND lane-ragged.  Blend the 128-divisible prefix in the
    # tiled kernel and the (<128-elem) tail with one jnp expression.
    flat1, flat2 = p1.reshape(-1), p2.reshape(-1)
    split = (n // _LANE) * _LANE
    head = _soft_update_tiled(flat1[:split], flat2[:split], update_rate,
                              _lane_cols(split))
    rate = float(update_rate)
    tail = (rate * flat1[split:].astype(jnp.float32)
            + (1.0 - rate) * flat2[split:].astype(jnp.float32)).astype(p1.dtype)
    return jnp.concatenate([head, tail]).reshape(p1.shape)


def soft_update_tree(params1, params2, update_rate):
    """Polyak update over a whole parameter pytree in ONE fused pallas_call.

    Each leaf pair gets its own input/output ref (whole-array blocks), so
    there is no concatenate/slice round trip and no dtype promotion -- every
    leaf keeps its own dtype.  Falls back to per-leaf tiled kernels when the
    fused working set would not fit comfortably in VMEM.
    """
    leaves1, treedef = jax.tree_util.tree_flatten(params1)
    leaves2 = jax.tree_util.tree_leaves(params2)
    assert len(leaves1) == len(leaves2)
    for l1, l2 in zip(leaves1, leaves2):
        assert l1.shape == l2.shape and l1.dtype == l2.dtype
    total_bytes = sum(int(l.nbytes) for l in leaves1)
    if not leaves1 or total_bytes > _FUSED_TREE_MAX_BYTES:
        outs = [soft_update(l1, l2, update_rate)
                for l1, l2 in zip(leaves1, leaves2)]
        return jax.tree_util.tree_unflatten(treedef, outs)
    n = len(leaves1)
    v1 = [_as_2d(l) for l in leaves1]
    v2 = [_as_2d(l) for l in leaves2]
    outs = pl.pallas_call(
        _make_fused_soft_update_kernel(n, float(update_rate)),
        out_shape=tuple(jax.ShapeDtypeStruct(v.shape, v.dtype) for v in v1),
        input_output_aliases={i: i for i in range(n)},
        compiler_params=pltpu.CompilerParams(vmem_limit_bytes=_VMEM_LIMIT_BYTES),
    )(*v1, *v2)
    if not isinstance(outs, (tuple, list)):
        outs = (outs,)
    outs = [o.reshape(l.shape) for o, l in zip(outs, leaves1)]
    return jax.tree_util.tree_unflatten(treedef, outs)


# TODO(synk): RLNetwork.train (optimizer.zero_grad / loss.backward / step) is
# host-side autograd/optimizer plumbing with no Pallas-kernel equivalent.


if __name__ == "__main__":
    key = jax.random.PRNGKey(0)
    k1, k2, k3, k4, k5, k6, k7 = jax.random.split(key, 7)

    # ---- forward: identity over (image-like, feature-map-like) inputs ------
    x = jax.random.normal(k1, (2, 4, 16, 16), dtype=jnp.float32)
    s = jax.random.normal(k2, (2, 8, 32), dtype=jnp.float32)

    outs = rl_network_forward(x, s)                  # true no-op identity
    assert outs[0] is x and outs[1] is s

    outs_k = rl_network_forward_pallas(x, s)         # fused single-kernel copy
    jax.block_until_ready(outs_k)
    assert outs_k[0].shape == x.shape and outs_k[0].dtype == x.dtype
    assert outs_k[1].shape == s.shape and outs_k[1].dtype == s.dtype
    assert bool(jnp.array_equal(outs_k[0], x)), "identity forward mismatch (x)"
    assert bool(jnp.array_equal(outs_k[1], s)), "identity forward mismatch (s)"

    rate = 0.005

    # ---- soft_update: small 128-divisible f32 parameters -------------------
    p1 = jax.random.normal(k3, (32, 32), dtype=jnp.float32)
    p2 = jax.random.normal(k4, (32, 32), dtype=jnp.float32)
    blended = soft_update(p1, p2, rate)
    jax.block_until_ready(blended)
    assert bool(jnp.allclose(blended, rate * p1 + (1.0 - rate) * p2, atol=1e-6))

    # ---- soft_update: multi-block grid with a masked partial last block ----
    w1 = jax.random.normal(k5, (1224, 256), dtype=jnp.float32)
    w2 = jax.random.normal(k6, (1224, 256), dtype=jnp.float32)
    wb = soft_update(w1, w2, rate)
    jax.block_until_ready(wb)
    assert bool(jnp.allclose(wb, rate * w1 + (1.0 - rate) * w2, atol=1e-6))

    # ---- soft_update: bf16 params (f32 accumulation inside the kernel) -----
    q1 = jax.random.normal(k7, (64, 128), dtype=jnp.float32).astype(jnp.bfloat16)
    q2 = (q1.astype(jnp.float32) + 1.0).astype(jnp.bfloat16)
    qb = soft_update(q1, q2, rate)
    jax.block_until_ready(qb)
    qref = (rate * q1.astype(jnp.float32)
            + (1.0 - rate) * q2.astype(jnp.float32)).astype(jnp.bfloat16)
    assert bool(jnp.allclose(qb.astype(jnp.float32), qref.astype(jnp.float32),
                             atol=1e-2))

    # ---- soft_update: lane-ragged small tensor (whole-array block path) ----
    r1 = jax.random.normal(k3, (7, 13), dtype=jnp.float32)
    r2 = jax.random.normal(k4, (7, 13), dtype=jnp.float32)
    rb = soft_update(r1, r2, rate)
    jax.block_until_ready(rb)
    assert bool(jnp.allclose(rb, rate * r1 + (1.0 - rate) * r2, atol=1e-6))

    # ---- soft_update_tree: fused single-call update, mixed dtypes ----------
    b1 = jax.random.normal(k5, (32,), dtype=jnp.float32)
    b2 = jax.random.normal(k6, (32,), dtype=jnp.float32)
    h1 = jax.random.normal(k7, (16, 24), dtype=jnp.bfloat16)
    h2 = jax.random.normal(k1, (16, 24), dtype=jnp.bfloat16)
    newp = soft_update_tree({"w": p1, "b": b1, "h": h1},
                            {"w": p2, "b": b2, "h": h2}, rate)
    jax.block_until_ready(newp)
    assert newp["w"].dtype == jnp.float32 and newp["h"].dtype == jnp.bfloat16
    assert bool(jnp.allclose(newp["w"], rate * p1 + (1.0 - rate) * p2, atol=1e-6))
    assert bool(jnp.allclose(newp["b"], rate * b1 + (1.0 - rate) * b2, atol=1e-6))
    href = (rate * h1.astype(jnp.float32)
            + (1.0 - rate) * h2.astype(jnp.float32)).astype(jnp.bfloat16)
    assert bool(jnp.allclose(newp["h"].astype(jnp.float32),
                             href.astype(jnp.float32), atol=1e-2))

    print("KERNEL_OK")
</pallas_src>

<mosaic_0001>
module attributes {stable_mosaic.version = 11 : i64} {
  func.func @kernel(%arg0: memref<2x4x16x16xf32, #tpu.memory_space<vmem>>, %arg1: memref<2x8x32xf32, #tpu.memory_space<vmem>>, %arg2: memref<2x4x16x16xf32, #tpu.memory_space<vmem>>, %arg3: memref<2x8x32xf32, #tpu.memory_space<vmem>>) attributes {dimension_semantics = [], scalar_prefetch = 0 : i64, scratch_operands = 0 : i64, tpu.core_type = #tpu.core_type<tc>} {
    %c0 = arith.constant 0 : index
    %c0_0 = arith.constant 0 : index
    %c0_1 = arith.constant 0 : index
    %c0_2 = arith.constant 0 : index
    %0 = vector.load %arg0[%c0, %c0_0, %c0_1, %c0_2] : memref<2x4x16x16xf32, #tpu.memory_space<vmem>>, vector<2x4x16x16xf32>
    %c0_3 = arith.constant 0 : index
    %c0_4 = arith.constant 0 : index
    %c0_5 = arith.constant 0 : index
    %c0_6 = arith.constant 0 : index
    %1 = vector.load %arg2[%c0_3, %c0_4, %c0_5, %c0_6] : memref<2x4x16x16xf32, #tpu.memory_space<vmem>>, vector<2x4x16x16xf32>
    tpu.vector_store %arg2[%c0_3, %c0_4, %c0_5, %c0_6], %0 {strides = array<i32>} : memref<2x4x16x16xf32, #tpu.memory_space<vmem>>, vector<2x4x16x16xf32>,
    %c0_7 = arith.constant 0 : index
    %c0_8 = arith.constant 0 : index
    %c0_9 = arith.constant 0 : index
    %2 = vector.load %arg1[%c0_7, %c0_8, %c0_9] : memref<2x8x32xf32, #tpu.memory_space<vmem>>, vector<2x8x32xf32>
    %c0_10 = arith.constant 0 : index
    %c0_11 = arith.constant 0 : index
    %c0_12 = arith.constant 0 : index
    %3 = vector.load %arg3[%c0_10, %c0_11, %c0_12] : memref<2x8x32xf32, #tpu.memory_space<vmem>>, vector<2x8x32xf32>
    tpu.vector_store %arg3[%c0_10, %c0_11, %c0_12], %2 {strides = array<i32>} : memref<2x8x32xf32, #tpu.memory_space<vmem>>, vector<2x8x32xf32>,
    return
  }
}

</mosaic_0001>

<bundles_post_ra>
// kernel: tpu_custom_call.1
= control target key start
LH: loop header
LB: loop body
LE: loop exit
PB: predicated region body
PF: predicated region fallthrough
CT: control target
= control target key end

     0   :  { %9 = vsyncpa [#allocation3], 0  ;;  %s328_s0 = inlined_call_operand.hbm [shape: f32[2,4,16,16], index: 0, kind: input, shape index: {}]   ;;  %s329_s1 = inlined_call_operand.hbm [shape: f32[2,8,32], index: 1, kind: input, shape index: {}]   ;;  %s330_s2 = inlined_call_operand.hbm [shape: f32[2,4,16,16], index: 2, kind: output, shape index: {0}]   ;;  %s331_s3 = inlined_call_operand.hbm [shape: f32[2,8,32], index: 3, kind: output, shape index: {1}]  }
   0x1   :  { %10 = vsyncpa [#allocation6], 0 }
   0x2   :  { %11 = vsyncpa [#allocation4], 0 }
   0x3   :  { %12 = vsyncpa [#allocation9], 0  ;;  %s217_s12 = smov [#allocation2]   ;;  %s121_s16 = scalar_lea.hbm %s328_s0, 2048 }
   0x4   :  { %s18_s13 = sshll.u32 %s217_s12, 4  ;;  %p122_p0 = scmp.ne.s32.totalorder %s328_s0, %s121_s16  ;;  %s19_s13 = int_to_ptr.vmem [resolvable:$true] %s18_s13 }
   0x5   :  { %p125_p1 = scmp.lt.u32.totalorder %s121_s16, %s328_s0 }
   0x7   :  { %p127_p2 = pnand %p125_p1, %p122_p0 }
   0x9   :  { %130 = shalt.err (!%p127_p2)
}
   0xa   :  { %s131_s21 = scalar_lea.vmem %s19_s13, 2048  ;;  %p136_p4 = scmp.lt.s32.totalorder %s19_s13, %s19_s13 }
   0xb   :  { %p132_p3 = scmp.ne.s32.totalorder %s19_s13, %s131_s21  ;;  %p137_p5 = scmp.lt.s32.totalorder %s131_s21, %s131_s21 }
   0xd   :  { %p138_p6 = por %p137_p5, %p136_p4 }
   0xf   :  { %p139_p7 = pnand %p138_p6, %p132_p3 }
  0x11   :  { %142 = shalt.err (!%p139_p7)
}
  0x12   :  { %s218_s22 = smov 128   ;;  %s219_s23 = smov 8  }
  0x13   :  { %24 = dma.hbm_to_vmem [thread:$0]  %s328_s0, 2048, %s19_s13, [#allocation3], %s218_s22, %s218_s22, %s219_s23  }
  0x14   :  { %s220_s26 = smov [#allocation5]   ;;  %s143_s30 = scalar_lea.hbm %s329_s1, 256 }
  0x15   :  { %s30_s27 = sshll.u32 %s220_s26, 4  ;;  %p144_p8 = scmp.ne.s32.totalorder %s329_s1, %s143_s30  ;;  %s31_s27 = int_to_ptr.vmem [resolvable:$true] %s30_s27 }
  0x16   :  { %p147_p9 = scmp.lt.u32.totalorder %s143_s30, %s329_s1 }
  0x18   :  { %p149_p10 = pnand %p147_p9, %p144_p8 }
  0x1a   :  { %152 = shalt.err (!%p149_p10)
}
  0x1b   :  { %s153_s8 = scalar_lea.vmem %s31_s27, 256  ;;  %p158_p12 = scmp.lt.s32.totalorder %s31_s27, %s31_s27 }
  0x1c   :  { %p154_p11 = scmp.ne.s32.totalorder %s31_s27, %s153_s8  ;;  %p159_p13 = scmp.lt.s32.totalorder %s153_s8, %s153_s8 }
  0x1e   :  { %p160_p0 = por %p159_p13, %p158_p12 }
  0x20   :  { %p161_p1 = pnand %p160_p0, %p154_p11 }
  0x22   :  { %164 = shalt.err (!%p161_p1)
}
  0x23   :  { %36 = dma.hbm_to_vmem [thread:$0]  %s329_s1, 256, %s31_s27, [#allocation6], %s218_s22, %s218_s22, %s219_s23  }
  0x24   :  { %209 = dma.done.wait [#allocation3], 2048  }
  0x25   :  { %210 = vsyncadd [#allocation3], 4294965248 }
  0x26   :  { %211 = dma.done.wait [#allocation6], 256  }
  0x27   :  { %212 = vsyncadd [#allocation6], 4294967040  ;;  %vm59_vm0 = vcmask 130048   ;;  %v43_v0 = vld [vmem:[#allocation2] sm:$0xff]  ;;  %v44_v1 = vld [vmem:[#allocation2 + $0x8] sm:$0xff]  ;;  %s221_s10 = smov [#allocation7]  }
  0x28   :  { %v45_v2 = vld [vmem:[#allocation2 + $0x10] sm:$0xff]  ;;  %60 = vst.msk [vmem:[#allocation7] sm:$0xff] %vm59_vm0, %v43_v0  ;;  %61 = vst.msk [vmem:[#allocation7 + $0x8] sm:$0xff] %vm59_vm0, %v44_v1  ;;  %v46_v3 = vld [vmem:[#allocation2 + $0x18] sm:$0xff]  ;;  %s86_s11 = sshll.u32 %s221_s10, 4  ;;  %s222_s1 = smov [#allocation8]   ;;  %s87_s11 = int_to_ptr.vmem [resolvable:$true] %s86_s11 }
  0x29   :  { %62 = vst.msk [vmem:[#allocation7 + $0x10] sm:$0xff] %vm59_vm0, %v45_v2  ;;  %v47_v4 = vld [vmem:[#allocation2 + $0x20] sm:$0xff]  ;;  %v48_v5 = vld [vmem:[#allocation2 + $0x28] sm:$0xff]  ;;  %63 = vst.msk [vmem:[#allocation7 + $0x18] sm:$0xff] %vm59_vm0, %v46_v3  ;;  %s98_s12 = sshll.u32 %s222_s1, 4  ;;  %vm78_vm1 = vcmask 261120   ;;  %p170_p3 = scmp.lt.s32.totalorder %s87_s11, %s87_s11  ;;  %s288_s12 = int_to_ptr.vmem [resolvable:$true] %s98_s12 }
  0x2a   :  { %64 = vst.msk [vmem:[#allocation7 + $0x20] sm:$0xff] %vm59_vm0, %v47_v4  ;;  %65 = vst.msk [vmem:[#allocation7 + $0x28] sm:$0xff] %vm59_vm0, %v48_v5  ;;  %v49_v6 = vld [vmem:[#allocation2 + $0x30] sm:$0xff]  ;;  %v50_v7 = vld [vmem:[#allocation2 + $0x38] sm:$0xff]  ;;  %s165_s13 = scalar_lea.vmem %s87_s11, 2048 }
  0x2b   :  { %v51_v8 = vld [vmem:[#allocation2 + $0x40] sm:$0xff]  ;;  %66 = vst.msk [vmem:[#allocation7 + $0x30] sm:$0xff] %vm59_vm0, %v49_v6  ;;  %67 = vst.msk [vmem:[#allocation7 + $0x38] sm:$0xff] %vm59_vm0, %v50_v7  ;;  %v52_v9 = vld [vmem:[#allocation2 + $0x48] sm:$0xff]  ;;  %p166_p2 = scmp.ne.s32.totalorder %s87_s11, %s165_s13  ;;  %p171_p4 = scmp.lt.s32.totalorder %s165_s13, %s165_s13 }
  0x2c   :  { %68 = vst.msk [vmem:[#allocation7 + $0x40] sm:$0xff] %vm59_vm0, %v51_v8  ;;  %v53_v10 = vld [vmem:[#allocation2 + $0x50] sm:$0xff]  ;;  %v54_v11 = vld [vmem:[#allocation2 + $0x58] sm:$0xff]  ;;  %69 = vst.msk [vmem:[#allocation7 + $0x48] sm:$0xff] %vm59_vm0, %v52_v9 }
  0x2d   :  { %70 = vst.msk [vmem:[#allocation7 + $0x50] sm:$0xff] %vm59_vm0, %v53_v10  ;;  %71 = vst.msk [vmem:[#allocation7 + $0x58] sm:$0xff] %vm59_vm0, %v54_v11  ;;  %v55_v12 = vld [vmem:[#allocation2 + $0x60] sm:$0xff]  ;;  %v56_v13 = vld [vmem:[#allocation2 + $0x68] sm:$0xff]  ;;  %p172_p5 = por %p171_p4, %p170_p3 }
  0x2e   :  { %v57_v14 = vld [vmem:[#allocation2 + $0x70] sm:$0xff]  ;;  %72 = vst.msk [vmem:[#allocation7 + $0x60] sm:$0xff] %vm59_vm0, %v55_v12  ;;  %73 = vst.msk [vmem:[#allocation7 + $0x68] sm:$0xff] %vm59_vm0, %v56_v13  ;;  %v58_v15 = vld [vmem:[#allocation2 + $0x78] sm:$0xff] }
  0x2f   :  { %74 = vst.msk [vmem:[#allocation7 + $0x70] sm:$0xff] %vm59_vm0, %v57_v14  ;;  %v76_v16 = vld [vmem:[#allocation5] sm:$0xff]  ;;  %v77_v17 = vld [vmem:[#allocation5 + $0x8] sm:$0xff]  ;;  %75 = vst.msk [vmem:[#allocation7 + $0x78] sm:$0xff] %vm59_vm0, %v58_v15  ;;  %p173_p6 = pnand %p172_p5, %p166_p2 }
  0x30   :  { %79 = vst.msk [vmem:[#allocation8] sm:$0xff] %vm78_vm1, %v76_v16  ;;  %80 = vst.msk [vmem:[#allocation8 + $0x8] sm:$0xff] %vm78_vm1, %v77_v17 }
  0x31   :  { %176 = shalt.err (!%p173_p6)
}
  0x32   :  { %s177_s16 = scalar_lea.hbm %s330_s2, 2048 }
  0x33   :  { %p178_p7 = scmp.ne.s32.totalorder %s330_s2, %s177_s16  ;;  %p181_p8 = scmp.lt.u32.totalorder %s177_s16, %s330_s2 }
  0x35   :  { %p183_p9 = pnand %p181_p8, %p178_p7 }
  0x37   :  { %186 = shalt.err (!%p183_p9)
}
  0x38   :  { %92 = dma.vmem_to_hbm [thread:$0]  %s87_s11, 2048, %s330_s2, [#allocation4], %s218_s22, %s218_s22, %s219_s23  }
  0x39   :  { %s187_s25 = scalar_lea.vmem %s288_s12, 256  ;;  %p192_p11 = scmp.lt.s32.totalorder %s288_s12, %s288_s12 }
  0x3a   :  { %p188_p10 = scmp.ne.s32.totalorder %s288_s12, %s187_s25  ;;  %p193_p12 = scmp.lt.s32.totalorder %s187_s25, %s187_s25 }
  0x3c   :  { %p194_p13 = por %p193_p12, %p192_p11 }
  0x3e   :  { %p195_p0 = pnand %p194_p13, %p188_p10 }
  0x40   :  { %198 = shalt.err (!%p195_p0)
}
  0x41   :  { %s199_s28 = scalar_lea.hbm %s331_s3, 256 }
  0x42   :  { %p200_p1 = scmp.ne.s32.totalorder %s331_s3, %s199_s28  ;;  %p203_p2 = scmp.lt.u32.totalorder %s199_s28, %s331_s3 }
  0x44   :  { %p205_p3 = pnand %p203_p2, %p200_p1 }
  0x46   :  { %208 = shalt.err (!%p205_p3)
}
  0x47   :  { %104 = dma.vmem_to_hbm [thread:$0]  %s288_s12, 256, %s331_s3, [#allocation9], %s218_s22, %s218_s22, %s219_s23  }
  0x48   :  { %213 = dma.done.wait [#allocation4], 2048  }
  0x49   :  { %214 = vsyncadd [#allocation4], 4294965248 }
  0x4a   :  { %215 = dma.done.wait [#allocation9], 256  }
  0x4b   :  { %216 = vsyncadd [#allocation9], 4294967040 }
  0x4c   :  { %111 = vsyncpa [#allocation3], 1 }
  0x4d   :  { %112 = vsyncpa [#allocation6], 1 }
  0x4e   :  { %113 = vsyncpa [#allocation4], 1 }
  0x4f   :  { %114 = vsyncpa [#allocation9], 1 }

</bundles_post_ra>
